<compile_context>
chip_gen: v5e
topology: v5e:2x2
jax: 0.10.0
libtpu: 0.0.40
codegen_flags: <defaults>
</compile_context>

<pallas_src>
import jax
import jax.numpy as jnp
from jax.experimental import pallas as pl
from jax.experimental.pallas import tpu as pltpu


def _round_up(n: int, m: int) -> int:
    return ((n + m - 1) // m) * m


def _lane(n: int) -> int:      # last-dim (lane) padding in VMEM
    return _round_up(n, 128)


def _sub(n: int) -> int:       # second-to-last-dim (sublane) padding, f32
    return _round_up(n, 8)


def mlp_logsoftmax_kernel(x_ref, w1_ref, b1_ref, wm_ref, bm_ref,
                          w2_ref, b2_ref, o_ref):
    x = x_ref[...]                                   # (TM, D) f32

    # fc1 + relu        (dropout1 is identity at inference)
    h = jnp.dot(x, w1_ref[...], preferred_element_type=jnp.float32) + b1_ref[...]
    h = jnp.maximum(h, 0.0)

    # fcm + relu        (dropout1 is identity at inference)
    h = jnp.dot(h, wm_ref[...], preferred_element_type=jnp.float32) + bm_ref[...]
    h = jnp.maximum(h, 0.0)

    # fc2               (dropout2 is identity at inference)
    logits = jnp.dot(h, w2_ref[...], preferred_element_type=jnp.float32) + b2_ref[...]

    # numerically-stable log_softmax along the last axis
    m = jnp.max(logits, axis=-1, keepdims=True)
    shifted = logits - m
    lse = jnp.log(jnp.sum(jnp.exp(shifted), axis=-1, keepdims=True))
    o_ref[...] = (shifted - lse).astype(o_ref.dtype)


_STREAM_VMEM_BUDGET = 24 * 2**20     # bytes budgeted for the streamed working set
_TM_MAX = 8192
_MIN_GRID_STEPS = 8                  # keep both v7x TensorCores busy when B allows


def _choose_tm(batch: int, d: int, h: int, c: int) -> int:
    """Batch-tile rows, sized from the lane-padded VMEM footprint per row."""
    # double-buffered x + out tiles, plus ~4 live lane-padded f32 intermediates
    per_row_bytes = 4 * (2 * _lane(d) + 2 * _lane(c) + 4 * _lane(h))
    tm = (_STREAM_VMEM_BUDGET // per_row_bytes) // 8 * 8
    tm = max(8, min(tm, _TM_MAX))
    tm = min(tm, _round_up(batch, 8))                          # never exceed batch
    tm = min(tm, max(8, _round_up(pl.cdiv(batch, _MIN_GRID_STEPS), 8)))
    return tm


def _vmem_limit_bytes(tm: int, d: int, h: int, c: int) -> int:
    stream = 4 * tm * (2 * _lane(d) + 2 * _lane(c) + 4 * _lane(h))
    # conservative: assume 2 pipeline buffers for every weight/bias (fallback path)
    weights = 2 * 4 * (_sub(d) * _lane(h) + _sub(h) * _lane(h) + _sub(h) * _lane(c)
                       + 2 * _sub(1) * _lane(h) + _sub(1) * _lane(c))
    est = int(1.25 * (stream + weights))
    # >= 32 MiB (never below generation defaults), <= 48 MiB (headroom on v7x 64 MiB)
    return min(max(est, 32 * 2**20), 48 * 2**20)


def model_forward(x, params):
    """x: [B, *features] float32 (flattened to [B, D]). Returns log_softmax [B, 4]."""
    w1, b1, wm, bm, w2, b2 = params

    B0 = x.shape[0]
    x2 = x.reshape(B0, -1)                 # nn.Flatten
    D = x2.shape[1]
    H = w1.shape[1]                        # 64
    C = w2.shape[1]                        # 4 terrains

    # Pad only to a sublane multiple (<= 7 extra rows, negligible copy); the
    # ragged last TM block is handled by Pallas clamping + OOB writeback drop.
    B = _round_up(B0, 8)
    if B != B0:
        x2 = jnp.pad(x2, ((0, B - B0), (0, 0)))

    TM = _choose_tm(B, D, H, C)
    grid = (pl.cdiv(B, TM),)

    cost = pl.CostEstimate(
        flops=2 * B0 * (D * H + H * H + H * C),
        transcendentals=B0 * (C + 1),      # exp per class + log per row
        bytes_accessed=4 * (B0 * D + B0 * C + D * H + H * H + H * C + 2 * H + C),
    )
    compiler_params = pltpu.CompilerParams(
        dimension_semantics=("parallel",),  # batch axis -> megacore sharding on v7x
        vmem_limit_bytes=_vmem_limit_bytes(TM, D, H, C),
    )

    def build_call(single_buffer_weights: bool):
        def resident(shape):
            kwargs = {}
            if single_buffer_weights and hasattr(pl, "Buffered"):
                # constant index_map -> never re-fetched; 2nd buffer is wasted VMEM
                kwargs["pipeline_mode"] = pl.Buffered(1)
            return pl.BlockSpec(shape, lambda i: (0, 0), **kwargs)

        streamed = lambda shape: pl.BlockSpec(shape, lambda i: (i, 0))

        return pl.pallas_call(
            mlp_logsoftmax_kernel,
            out_shape=jax.ShapeDtypeStruct((B, C), jnp.float32),
            grid=grid,
            in_specs=[
                streamed((TM, D)),   # x tile (software-pipelined per grid step)
                resident((D, H)),    # w1
                resident((1, H)),    # b1
                resident((H, H)),    # wm
                resident((1, H)),    # bm
                resident((H, C)),    # w2
                resident((1, C)),    # b2
            ],
            out_specs=streamed((TM, C)),
            compiler_params=compiler_params,
            cost_estimate=cost,
        )

    try:
        out = build_call(True)(x2, w1, b1, wm, bm, w2, b2)
    except Exception:
        # Fallback if this JAX build rejects pipeline_mode / Buffered(1).
        out = build_call(False)(x2, w1, b1, wm, bm, w2, b2)

    return out[:B0]


def xavier_uniform(key, fan_in, fan_out, dtype=jnp.float32):
    # matches torch.nn.init.xavier_uniform_ bound
    bound = (6.0 / (fan_in + fan_out)) ** 0.5
    return jax.random.uniform(key, (fan_in, fan_out), dtype,
                              minval=-bound, maxval=bound)


def init_params(key, input_dim, hidden=64, num_terrains=4):
    k1, k2, k3 = jax.random.split(key, 3)
    w1 = xavier_uniform(k1, input_dim, hidden)
    wm = xavier_uniform(k2, hidden, hidden)
    w2 = xavier_uniform(k3, hidden, num_terrains)
    b1 = jnp.full((1, hidden), 0.01, jnp.float32)
    bm = jnp.full((1, hidden), 0.01, jnp.float32)
    b2 = jnp.full((1, num_terrains), 0.01, jnp.float32)
    return (w1, b1, wm, bm, w2, b2)


if __name__ == "__main__":
    input_dim = 6     # e.g. one FTS

    key = jax.random.PRNGKey(0)
    k_x, k_p = jax.random.split(key)
    params = init_params(k_p, input_dim)
    w1, b1, wm, bm, w2, b2 = params

    # batch=8:  single full tile.   batch=13: pad-to-8 path (rows sliced off).
    # batch=72: multi-step grid with a ragged (clamped) last block.
    for batch in (8, 13, 72):
        x = jax.random.normal(jax.random.fold_in(k_x, batch),
                              (batch, input_dim), jnp.float32)
        out = jax.block_until_ready(model_forward(x, params))

        # pure-JAX reference for correctness
        h = jnp.maximum(x @ w1 + b1, 0.0)
        h = jnp.maximum(h @ wm + bm, 0.0)
        ref = jax.nn.log_softmax(h @ w2 + b2, axis=-1)

        assert out.shape == (batch, 4)
        assert jnp.allclose(out, ref, atol=1e-5), f"mismatch vs reference (B={batch})"
        assert jnp.allclose(jnp.sum(jnp.exp(out), axis=-1), 1.0, atol=1e-5)

    print("KERNEL_OK")
</pallas_src>

<mosaic_0001>
module attributes {stable_mosaic.version = 11 : i64} {
  func.func @mlp_logsoftmax_kernel(%arg0: i32, %arg1: memref<8x6xf32, #tpu.memory_space<vmem>>, %arg2: memref<6x64xf32, #tpu.memory_space<vmem>>, %arg3: memref<1x64xf32, #tpu.memory_space<vmem>>, %arg4: memref<64x64xf32, #tpu.memory_space<vmem>>, %arg5: memref<1x64xf32, #tpu.memory_space<vmem>>, %arg6: memref<64x4xf32, #tpu.memory_space<vmem>>, %arg7: memref<1x4xf32, #tpu.memory_space<vmem>>, %arg8: memref<8x4xf32, #tpu.memory_space<vmem>>) attributes {dimension_semantics = [#tpu.dimension_semantics<parallel>], iteration_bounds = array<i64: 1>, scalar_prefetch = 0 : i64, scratch_operands = 0 : i64, tpu.core_type = #tpu.core_type<tc>, window_params = [{transform_indices = @transform_0, window_bounds = array<i64: 8, 6>}, {pipeline_mode = #tpu.pipeline_mode<synchronous>, transform_indices = @transform_1, window_bounds = array<i64: 6, 64>}, {pipeline_mode = #tpu.pipeline_mode<synchronous>, transform_indices = @transform_2, window_bounds = array<i64: 1, 64>}, {pipeline_mode = #tpu.pipeline_mode<synchronous>, transform_indices = @transform_3, window_bounds = array<i64: 64, 64>}, {pipeline_mode = #tpu.pipeline_mode<synchronous>, transform_indices = @transform_4, window_bounds = array<i64: 1, 64>}, {pipeline_mode = #tpu.pipeline_mode<synchronous>, transform_indices = @transform_5, window_bounds = array<i64: 64, 4>}, {pipeline_mode = #tpu.pipeline_mode<synchronous>, transform_indices = @transform_6, window_bounds = array<i64: 1, 4>}, {transform_indices = @transform_7, window_bounds = array<i64: 8, 4>}]} {
    %c0 = arith.constant 0 : index
    %c0_0 = arith.constant 0 : index
    %0 = vector.load %arg1[%c0, %c0_0] : memref<8x6xf32, #tpu.memory_space<vmem>>, vector<8x6xf32>
    %c0_1 = arith.constant 0 : index
    %c0_2 = arith.constant 0 : index
    %1 = vector.load %arg2[%c0_1, %c0_2] : memref<6x64xf32, #tpu.memory_space<vmem>>, vector<6x64xf32>
    %cst = arith.constant dense<0.000000e+00> : vector<8x64xf32>
    %2 = tpu.matmul %0, %1, %cst {dimension_numbers = #tpu.dot_dimension_numbers<[1], [0], [0], [1], [0, 0, 1, 1], [], []>} : vector<8x6xf32>, vector<6x64xf32>, vector<8x64xf32> -> vector<8x64xf32>
    %c0_3 = arith.constant 0 : index
    %c0_4 = arith.constant 0 : index
    %3 = vector.load %arg3[%c0_3, %c0_4] : memref<1x64xf32, #tpu.memory_space<vmem>>, vector<1x64xf32>
    %4 = vector.broadcast %3 : vector<1x64xf32> to vector<8x64xf32>
    %5 = arith.addf %2, %4 : vector<8x64xf32>
    %cst_5 = arith.constant 0.000000e+00 : f32
    %6 = vector.broadcast %cst_5 : f32 to vector<8x64xf32>
    %7 = arith.maximumf %5, %6 : vector<8x64xf32>
    %c0_6 = arith.constant 0 : index
    %c0_7 = arith.constant 0 : index
    %8 = vector.load %arg4[%c0_6, %c0_7] : memref<64x64xf32, #tpu.memory_space<vmem>>, vector<64x64xf32>
    %cst_8 = arith.constant dense<0.000000e+00> : vector<8x64xf32>
    %9 = tpu.matmul %7, %8, %cst_8 {dimension_numbers = #tpu.dot_dimension_numbers<[1], [0], [0], [1], [0, 0, 1, 1], [], []>} : vector<8x64xf32>, vector<64x64xf32>, vector<8x64xf32> -> vector<8x64xf32>
    %c0_9 = arith.constant 0 : index
    %c0_10 = arith.constant 0 : index
    %10 = vector.load %arg5[%c0_9, %c0_10] : memref<1x64xf32, #tpu.memory_space<vmem>>, vector<1x64xf32>
    %11 = vector.broadcast %10 : vector<1x64xf32> to vector<8x64xf32>
    %12 = arith.addf %9, %11 : vector<8x64xf32>
    %cst_11 = arith.constant 0.000000e+00 : f32
    %13 = vector.broadcast %cst_11 : f32 to vector<8x64xf32>
    %14 = arith.maximumf %12, %13 : vector<8x64xf32>
    %c0_12 = arith.constant 0 : index
    %c0_13 = arith.constant 0 : index
    %15 = vector.load %arg6[%c0_12, %c0_13] : memref<64x4xf32, #tpu.memory_space<vmem>>, vector<64x4xf32>
    %cst_14 = arith.constant dense<0.000000e+00> : vector<8x4xf32>
    %16 = tpu.matmul %14, %15, %cst_14 {dimension_numbers = #tpu.dot_dimension_numbers<[1], [0], [0], [1], [0, 0, 1, 1], [], []>} : vector<8x64xf32>, vector<64x4xf32>, vector<8x4xf32> -> vector<8x4xf32>
    %c0_15 = arith.constant 0 : index
    %c0_16 = arith.constant 0 : index
    %17 = vector.load %arg7[%c0_15, %c0_16] : memref<1x4xf32, #tpu.memory_space<vmem>>, vector<1x4xf32>
    %18 = vector.broadcast %17 : vector<1x4xf32> to vector<8x4xf32>
    %19 = arith.addf %16, %18 : vector<8x4xf32>
    %cst_17 = arith.constant dense<0xFF800000> : vector<8xf32>
    %20 = vector.multi_reduction <maximumf>, %19, %cst_17 [1] : vector<8x4xf32> to vector<8xf32>
    %21 = vector.shape_cast %20 : vector<8xf32> to vector<8x1xf32>
    %22 = vector.broadcast %21 : vector<8x1xf32> to vector<8x4xf32>
    %23 = arith.subf %19, %22 : vector<8x4xf32>
    %24 = math.exp %23 : vector<8x4xf32>
    %cst_18 = arith.constant dense<0.000000e+00> : vector<8xf32>
    %25 = vector.multi_reduction <add>, %24, %cst_18 [1] : vector<8x4xf32> to vector<8xf32>
    %26 = vector.shape_cast %25 : vector<8xf32> to vector<8x1xf32>
    %27 = math.log %26 : vector<8x1xf32>
    %28 = vector.broadcast %27 : vector<8x1xf32> to vector<8x4xf32>
    %29 = arith.subf %23, %28 : vector<8x4xf32>
    %c0_19 = arith.constant 0 : index
    %c0_20 = arith.constant 0 : index
    %30 = vector.load %arg8[%c0_19, %c0_20] : memref<8x4xf32, #tpu.memory_space<vmem>>, vector<8x4xf32>
    tpu.vector_store %arg8[%c0_19, %c0_20], %29 {strides = array<i32>} : memref<8x4xf32, #tpu.memory_space<vmem>>, vector<8x4xf32>,
    return
  }
  func.func @transform_0(%arg0: i32) -> (i32, i32) {
    %c0_i32 = arith.constant 0 : i32
    %c0_i32_0 = arith.constant 0 : i32
    return %arg0, %c0_i32 : i32, i32
  }
  func.func @transform_1(%arg0: i32) -> (i32, i32) {
    %c0_i32 = arith.constant 0 : i32
    %c0_i32_0 = arith.constant 0 : i32
    %c0_i32_1 = arith.constant 0 : i32
    return %c0_i32, %c0_i32_0 : i32, i32
  }
  func.func @transform_2(%arg0: i32) -> (i32, i32) {
    %c0_i32 = arith.constant 0 : i32
    %c0_i32_0 = arith.constant 0 : i32
    %c0_i32_1 = arith.constant 0 : i32
    return %c0_i32, %c0_i32_0 : i32, i32
  }
  func.func @transform_3(%arg0: i32) -> (i32, i32) {
    %c0_i32 = arith.constant 0 : i32
    %c0_i32_0 = arith.constant 0 : i32
    %c0_i32_1 = arith.constant 0 : i32
    return %c0_i32, %c0_i32_0 : i32, i32
  }
  func.func @transform_4(%arg0: i32) -> (i32, i32) {
    %c0_i32 = arith.constant 0 : i32
    %c0_i32_0 = arith.constant 0 : i32
    %c0_i32_1 = arith.constant 0 : i32
    return %c0_i32, %c0_i32_0 : i32, i32
  }
  func.func @transform_5(%arg0: i32) -> (i32, i32) {
    %c0_i32 = arith.constant 0 : i32
    %c0_i32_0 = arith.constant 0 : i32
    %c0_i32_1 = arith.constant 0 : i32
    return %c0_i32, %c0_i32_0 : i32, i32
  }
  func.func @transform_6(%arg0: i32) -> (i32, i32) {
    %c0_i32 = arith.constant 0 : i32
    %c0_i32_0 = arith.constant 0 : i32
    %c0_i32_1 = arith.constant 0 : i32
    return %c0_i32, %c0_i32_0 : i32, i32
  }
  func.func @transform_7(%arg0: i32) -> (i32, i32) {
    %c0_i32 = arith.constant 0 : i32
    %c0_i32_0 = arith.constant 0 : i32
    return %arg0, %c0_i32 : i32, i32
  }
}

module attributes {stable_mosaic.version = 11 : i64} {
  func.func @mlp_logsoftmax_kernel(%arg0: i32, %arg1: memref<8x6xf32, #tpu.memory_space<vmem>>, %arg2: memref<6x64xf32, #tpu.memory_space<vmem>>, %arg3: memref<1x64xf32, #tpu.memory_space<vmem>>, %arg4: memref<64x64xf32, #tpu.memory_space<vmem>>, %arg5: memref<1x64xf32, #tpu.memory_space<vmem>>, %arg6: memref<64x4xf32, #tpu.memory_space<vmem>>, %arg7: memref<1x4xf32, #tpu.memory_space<vmem>>, %arg8: memref<8x4xf32, #tpu.memory_space<vmem>>) attributes {dimension_semantics = [#tpu.dimension_semantics<parallel>], iteration_bounds = array<i64: 1>, scalar_prefetch = 0 : i64, scratch_operands = 0 : i64, tpu.core_type = #tpu.core_type<tc>, window_params = [{transform_indices = @transform_0, window_bounds = array<i64: 8, 6>}, {pipeline_mode = #tpu.pipeline_mode<synchronous>, transform_indices = @transform_1, window_bounds = array<i64: 6, 64>}, {pipeline_mode = #tpu.pipeline_mode<synchronous>, transform_indices = @transform_2, window_bounds = array<i64: 1, 64>}, {pipeline_mode = #tpu.pipeline_mode<synchronous>, transform_indices = @transform_3, window_bounds = array<i64: 64, 64>}, {pipeline_mode = #tpu.pipeline_mode<synchronous>, transform_indices = @transform_4, window_bounds = array<i64: 1, 64>}, {pipeline_mode = #tpu.pipeline_mode<synchronous>, transform_indices = @transform_5, window_bounds = array<i64: 64, 4>}, {pipeline_mode = #tpu.pipeline_mode<synchronous>, transform_indices = @transform_6, window_bounds = array<i64: 1, 4>}, {transform_indices = @transform_7, window_bounds = array<i64: 8, 4>}]} {
    %c0 = arith.constant 0 : index
    %c0_0 = arith.constant 0 : index
    %0 = vector.load %arg1[%c0, %c0_0] : memref<8x6xf32, #tpu.memory_space<vmem>>, vector<8x6xf32>
    %c0_1 = arith.constant 0 : index
    %c0_2 = arith.constant 0 : index
    %1 = vector.load %arg2[%c0_1, %c0_2] : memref<6x64xf32, #tpu.memory_space<vmem>>, vector<6x64xf32>
    %cst = arith.constant dense<0.000000e+00> : vector<8x64xf32>
    %2 = tpu.matmul %0, %1, %cst {dimension_numbers = #tpu.dot_dimension_numbers<[1], [0], [0], [1], [0, 0, 1, 1], [], []>} : vector<8x6xf32>, vector<6x64xf32>, vector<8x64xf32> -> vector<8x64xf32>
    %c0_3 = arith.constant 0 : index
    %c0_4 = arith.constant 0 : index
    %3 = vector.load %arg3[%c0_3, %c0_4] : memref<1x64xf32, #tpu.memory_space<vmem>>, vector<1x64xf32>
    %4 = vector.broadcast %3 : vector<1x64xf32> to vector<8x64xf32>
    %5 = arith.addf %2, %4 : vector<8x64xf32>
    %cst_5 = arith.constant 0.000000e+00 : f32
    %6 = vector.broadcast %cst_5 : f32 to vector<8x64xf32>
    %7 = arith.maximumf %5, %6 : vector<8x64xf32>
    %c0_6 = arith.constant 0 : index
    %c0_7 = arith.constant 0 : index
    %8 = vector.load %arg4[%c0_6, %c0_7] : memref<64x64xf32, #tpu.memory_space<vmem>>, vector<64x64xf32>
    %cst_8 = arith.constant dense<0.000000e+00> : vector<8x64xf32>
    %9 = tpu.matmul %7, %8, %cst_8 {dimension_numbers = #tpu.dot_dimension_numbers<[1], [0], [0], [1], [0, 0, 1, 1], [], []>} : vector<8x64xf32>, vector<64x64xf32>, vector<8x64xf32> -> vector<8x64xf32>
    %c0_9 = arith.constant 0 : index
    %c0_10 = arith.constant 0 : index
    %10 = vector.load %arg5[%c0_9, %c0_10] : memref<1x64xf32, #tpu.memory_space<vmem>>, vector<1x64xf32>
    %11 = vector.broadcast %10 : vector<1x64xf32> to vector<8x64xf32>
    %12 = arith.addf %9, %11 : vector<8x64xf32>
    %cst_11 = arith.constant 0.000000e+00 : f32
    %13 = vector.broadcast %cst_11 : f32 to vector<8x64xf32>
    %14 = arith.maximumf %12, %13 : vector<8x64xf32>
    %c0_12 = arith.constant 0 : index
    %c0_13 = arith.constant 0 : index
    %15 = vector.load %arg6[%c0_12, %c0_13] : memref<64x4xf32, #tpu.memory_space<vmem>>, vector<64x4xf32>
    %cst_14 = arith.constant dense<0.000000e+00> : vector<8x4xf32>
    %16 = tpu.matmul %14, %15, %cst_14 {dimension_numbers = #tpu.dot_dimension_numbers<[1], [0], [0], [1], [0, 0, 1, 1], [], []>} : vector<8x64xf32>, vector<64x4xf32>, vector<8x4xf32> -> vector<8x4xf32>
    %c0_15 = arith.constant 0 : index
    %c0_16 = arith.constant 0 : index
    %17 = vector.load %arg7[%c0_15, %c0_16] : memref<1x4xf32, #tpu.memory_space<vmem>>, vector<1x4xf32>
    %18 = vector.broadcast %17 : vector<1x4xf32> to vector<8x4xf32>
    %19 = arith.addf %16, %18 : vector<8x4xf32>
    %cst_17 = arith.constant dense<0xFF800000> : vector<8xf32>
    %20 = vector.multi_reduction <maximumf>, %19, %cst_17 [1] : vector<8x4xf32> to vector<8xf32>
    %21 = vector.shape_cast %20 : vector<8xf32> to vector<8x1xf32>
    %22 = vector.broadcast %21 : vector<8x1xf32> to vector<8x4xf32>
    %23 = arith.subf %19, %22 : vector<8x4xf32>
    %24 = math.exp %23 : vector<8x4xf32>
    %cst_18 = arith.constant dense<0.000000e+00> : vector<8xf32>
    %25 = vector.multi_reduction <add>, %24, %cst_18 [1] : vector<8x4xf32> to vector<8xf32>
    %26 = vector.shape_cast %25 : vector<8xf32> to vector<8x1xf32>
    %27 = math.log %26 : vector<8x1xf32>
    %28 = vector.broadcast %27 : vector<8x1xf32> to vector<8x4xf32>
    %29 = arith.subf %23, %28 : vector<8x4xf32>
    %c0_19 = arith.constant 0 : index
    %c0_20 = arith.constant 0 : index
    %30 = vector.load %arg8[%c0_19, %c0_20] : memref<8x4xf32, #tpu.memory_space<vmem>>, vector<8x4xf32>
    tpu.vector_store %arg8[%c0_19, %c0_20], %29 {strides = array<i32>} : memref<8x4xf32, #tpu.memory_space<vmem>>, vector<8x4xf32>,
    return
  }
  func.func @transform_0(%arg0: i32) -> (i32, i32) {
    %c0_i32 = arith.constant 0 : i32
    %c0_i32_0 = arith.constant 0 : i32
    return %arg0, %c0_i32 : i32, i32
  }
  func.func @transform_1(%arg0: i32) -> (i32, i32) {
    %c0_i32 = arith.constant 0 : i32
    %c0_i32_0 = arith.constant 0 : i32
    %c0_i32_1 = arith.constant 0 : i32
    return %c0_i32, %c0_i32_0 : i32, i32
  }
  func.func @transform_2(%arg0: i32) -> (i32, i32) {
    %c0_i32 = arith.constant 0 : i32
    %c0_i32_0 = arith.constant 0 : i32
    %c0_i32_1 = arith.constant 0 : i32
    return %c0_i32, %c0_i32_0 : i32, i32
  }
  func.func @transform_3(%arg0: i32) -> (i32, i32) {
    %c0_i32 = arith.constant 0 : i32
    %c0_i32_0 = arith.constant 0 : i32
    %c0_i32_1 = arith.constant 0 : i32
    return %c0_i32, %c0_i32_0 : i32, i32
  }
  func.func @transform_4(%arg0: i32) -> (i32, i32) {
    %c0_i32 = arith.constant 0 : i32
    %c0_i32_0 = arith.constant 0 : i32
    %c0_i32_1 = arith.constant 0 : i32
    return %c0_i32, %c0_i32_0 : i32, i32
  }
  func.func @transform_5(%arg0: i32) -> (i32, i32) {
    %c0_i32 = arith.constant 0 : i32
    %c0_i32_0 = arith.constant 0 : i32
    %c0_i32_1 = arith.constant 0 : i32
    return %c0_i32, %c0_i32_0 : i32, i32
  }
  func.func @transform_6(%arg0: i32) -> (i32, i32) {
    %c0_i32 = arith.constant 0 : i32
    %c0_i32_0 = arith.constant 0 : i32
    %c0_i32_1 = arith.constant 0 : i32
    return %c0_i32, %c0_i32_0 : i32, i32
  }
  func.func @transform_7(%arg0: i32) -> (i32, i32) {
    %c0_i32 = arith.constant 0 : i32
    %c0_i32_0 = arith.constant 0 : i32
    return %arg0, %c0_i32 : i32, i32
  }
}

</mosaic_0001>

<bundles_post_ra>
// kernel: tpu_custom_call.1
= control target key start
LH: loop header
LB: loop body
LE: loop exit
PB: predicated region body
PF: predicated region fallthrough
CT: control target
= control target key end

     0   :  { %12 = vsyncpa [#allocation3], 0  ;;  %s357_s0 = inlined_call_operand.hbm [shape: f32[8,6], index: 0, kind: input, shape index: {}]   ;;  %s358_s1 = inlined_call_operand.hbm [shape: f32[6,64], index: 1, kind: input, shape index: {}]   ;;  %s359_s2 = inlined_call_operand.vmem [shape: f32[1,64], index: 2, kind: input, shape index: {}]   ;;  %s360_s3 = inlined_call_operand.vmem [shape: f32[64,64], index: 3, kind: input, shape index: {}]   ;;  %s361_s4 = inlined_call_operand.vmem [shape: f32[1,64], index: 4, kind: input, shape index: {}]   ;;  %s362_s5 = inlined_call_operand.vmem [shape: f32[64,4], index: 5, kind: input, shape index: {}]   ;;  %s363_s6 = inlined_call_operand.vmem [shape: f32[1,4], index: 6, kind: input, shape index: {}]   ;;  %s364_s7 = inlined_call_operand.vmem [shape: f32[8,4], index: 7, kind: output, shape index: {}]  }
   0x1   :  { %s19_s26 = sshll.u32 %s357_s0, 4  ;;  %s20_s26 = int_to_ptr.hbm [resolvable:$true] %s19_s26 }
   0x2   :  { %13 = vsyncpa [#allocation5], 0  ;;  %s246_s27 = smov [#allocation2]   ;;  %s30_s8 = sshll.u32 %s358_s1, 4  ;;  %s31_s8 = int_to_ptr.hbm [resolvable:$true] %s30_s8 }
   0x3   :  { %s21_s28 = sshll.u32 %s246_s27, 4  ;;  %s247_s9 = smov [#allocation4]   ;;  %s22_s28 = int_to_ptr.vmem [resolvable:$true] %s21_s28 }
   0x4   :  { %24 = dma.hbm_to_vmem [thread:$0]  %s20_s26, 128, %s22_s28, [#allocation3]  }
   0x5   :  { %s32_s10 = sshll.u32 %s247_s9, 4  ;;  %s33_s10 = int_to_ptr.vmem [resolvable:$true] %s32_s10 }
   0x6   :  { %35 = dma.hbm_to_vmem [thread:$0]  %s31_s8, 128, %s33_s10, [#allocation5]  }
   0x7   :  { %242 = dma.done.wait [#allocation3], 128  }
   0x8   :  { %243 = vsyncadd [#allocation3], 4294967168 }
   0x9   :  { %244 = dma.done.wait [#allocation5], 128  }
   0xa   :  { %245 = vsyncadd [#allocation5], 4294967168  ;;  %vm64_vm0 = vcmask 1045504   ;;  %vm60_vm1 = vcmask 48128   ;;  %v55_v0 = vld [vmem:[#allocation4] sm:$0x3f] }
   0xb   :  { %v54_v1 = vld [vmem:[#allocation2] sm:$0xff]  ;;  %v96_v2 = vld [vmem:[%s360_s3 + $0x38] sm:$0xff]  ;;  %181 = vmatpush.msk.msra.mxu0 %vm64_vm0, %v55_v0  ;;  %v95_v3 = vld [vmem:[%s360_s3 + $0x30] sm:$0xff]  ;;  %vm101_vm2 = vcmask 523264   ;;  %vm161_vm3 = vcmask 31744  }
   0xc   :  { %113 = vmatpush.msra.mxu1 %v96_v2  ;;  %182 = vmatmul.msk.f32.vlgmr.msra.gmra.mxu0 %vm60_vm1, %v54_v1  ;;  %v94_v4 = vld [vmem:[%s360_s3 + $0x28] sm:$0xff]  ;;  %v93_v5 = vld [vmem:[%s360_s3 + $0x20] sm:$0xff]  ;;  %v92_v6 = vld [vmem:[%s360_s3 + $0x18] sm:$0xff] }
   0xd   :  { %v91_v7 = vld [vmem:[%s360_s3 + $0x10] sm:$0xff]  ;;  %v90_v8 = vld [vmem:[%s360_s3 + $0x8] sm:$0xff]  ;;  %v89_v9 = vld [vmem:[%s360_s3] sm:$0xff] }
   0xe   :  { %114 = vmatpush.msra.mxu1 %v95_v3  ;;  %v133_v10 = vld [vmem:[%s362_s5 + $0x38] sm:$0xff]  ;;  %v132_v11 = vld [vmem:[%s362_s5 + $0x30] sm:$0xff]  ;;  %v131_v12 = vld [vmem:[%s362_s5 + $0x28] sm:$0xff] }
   0xf   :  { %149 = vmatpush.msra.mxu2 %v133_v10  ;;  %v130_v13 = vld [vmem:[%s362_s5 + $0x20] sm:$0xff]  ;;  %v129_v14 = vld [vmem:[%s362_s5 + $0x18] sm:$0xff]  ;;  %v128_v19 = vld [vmem:[%s362_s5 + $0x10] sm:$0xff] }
  0x10   :  { %115 = vmatpush.msra.mxu1 %v94_v4  ;;  %v187_v15 = vld [vmem:[%s359_s2] ss:$0 sm:$0xff]  ;;  %v127_v20 = vld [vmem:[%s362_s5 + $0x8] sm:$0xff] }
  0x11   :  { %150 = vmatpush.msra.mxu2 %v132_v11  ;;  %v126_v21 = vld [vmem:[%s362_s5] sm:$0xff] }
  0x12   :  { %116 = vmatpush.msra.mxu1 %v93_v5  ;;  %v188_v22 = vld [vmem:[%s361_s4] ss:$0 sm:$0xff] }
  0x13   :  { %151 = vmatpush.msra.mxu2 %v131_v12  ;;  %v189_v26 = vld [vmem:[%s363_s6] ss:$0 sm:$0xff] }
  0x14   :  { %117 = vmatpush.msra.mxu1 %v92_v6 }
  0x15   :  { %152 = vmatpush.msra.mxu2 %v130_v13 }
  0x16   :  { %118 = vmatpush.msra.mxu1 %v91_v7 }
  0x17   :  { %153 = vmatpush.msra.mxu2 %v129_v14 }
  0x18   :  { %119 = vmatpush.msra.mxu1 %v90_v8 }
  0x19   :  { %154 = vmatpush.msra.mxu2 %v128_v19 }
  0x1a   :  { %120 = vmatpush.msra.mxu1 %v89_v9 }
  0x1b   :  { %155 = vmatpush.msra.mxu2 %v127_v20 }
  0x1d   :  { %156 = vmatpush.msra.mxu2 %v126_v21 }
  0x89   :  { %v85_v16 = vpop.f32.mrf.mxu0 }
  0x8a   :  { %v86_v17 = vadd.f32 %v187_v15, %v85_v16 }
  0x8c   :  { %v88_v18 = vmax.f32 %v86_v17, 0.0 }
  0x8e   :  { %183 = vmatmul.msk.f32.vlgmr.msra.gmra.mxu1 %vm101_vm2, %v88_v18 }
 0x10b   :  { %v122_v23 = vpop.f32.mrf.mxu1 }
 0x10c   :  { %v123_v24 = vadd.f32 %v188_v22, %v122_v23 }
 0x10e   :  { %v125_v25 = vmax.f32 %v123_v24, 0.0 }
 0x110   :  { %184 = vmatmul.msk.f32.vlgmr.msra.gmra.mxu2 %vm101_vm2, %v125_v25 }
 0x193   :  { %v158_v27 = vpop.f32.mrf.mxu2 }
 0x194   :  { %v159_v28 = vadd.f32 %v189_v26, %v158_v27 }
 0x196   :  { %v162_v29 = vsel %vm161_vm3, %v159_v28, -inf }
 0x197   :  { %163 = vmax.xlane.f32.xlu0 %v162_v29 }
 0x20a   :  { %v164_v30 = vpop.xlane.xlu0 %163 }
 0x20b   :  { %v165_v31 = vsub.f32 %v159_v28, %v164_v30 }
 0x20d   :  { %v166_v32 = vmul.f32 1.442695, %v165_v31 }
 0x20f   :  { %190 = vpow2.f32 %v166_v32 }
 0x215   :  { %v191_v33 = vpop.eup %190 }
 0x216   :  { %v168_v34 = vsel %vm161_vm3, %v191_v33, 0.0 }
 0x217   :  { %169 = vadd.xlane.f32.xlu0 %v168_v34 }
 0x28a   :  { %v170_v35 = vpop.xlane.xlu0 %169 }
 0x28b   :  { %192 = vlog2.f32 %v170_v35 }
 0x291   :  { %v193_v36 = vpop.eup %192 }
 0x292   :  { %v172_v37 = vmul.f32 0.6931472, %v193_v36 }
 0x294   :  { %v173_v38 = vsub.f32 %v165_v31, %v172_v37 }
 0x296   :  { %174 = vst.msk [vmem:[%s364_s7] sm:$0xff] %vm161_vm3, %v173_v38 }
 0x297   :  { %179 = vsyncpa [#allocation3], 1 }
 0x298   :  { %180 = vsyncpa [#allocation5], 1 }

// kernel: tpu_custom_call.1
= control target key start
LH: loop header
LB: loop body
LE: loop exit
PB: predicated region body
PF: predicated region fallthrough
CT: control target
= control target key end

     0   :  { %12 = vsyncpa [#allocation3], 0  ;;  %s357_s0 = inlined_call_operand.hbm [shape: f32[8,6], index: 0, kind: input, shape index: {}]   ;;  %s358_s1 = inlined_call_operand.hbm [shape: f32[6,64], index: 1, kind: input, shape index: {}]   ;;  %s359_s2 = inlined_call_operand.vmem [shape: f32[1,64], index: 2, kind: input, shape index: {}]   ;;  %s360_s3 = inlined_call_operand.vmem [shape: f32[64,64], index: 3, kind: input, shape index: {}]   ;;  %s361_s4 = inlined_call_operand.vmem [shape: f32[1,64], index: 4, kind: input, shape index: {}]   ;;  %s362_s5 = inlined_call_operand.vmem [shape: f32[64,4], index: 5, kind: input, shape index: {}]   ;;  %s363_s6 = inlined_call_operand.vmem [shape: f32[1,4], index: 6, kind: input, shape index: {}]   ;;  %s364_s7 = inlined_call_operand.vmem [shape: f32[8,4], index: 7, kind: output, shape index: {}]  }
   0x1   :  { %s19_s26 = sshll.u32 %s357_s0, 4  ;;  %s20_s26 = int_to_ptr.hbm [resolvable:$true] %s19_s26 }
   0x2   :  { %13 = vsyncpa [#allocation5], 0  ;;  %s246_s27 = smov [#allocation2]   ;;  %s30_s8 = sshll.u32 %s358_s1, 4  ;;  %s31_s8 = int_to_ptr.hbm [resolvable:$true] %s30_s8 }
   0x3   :  { %s21_s28 = sshll.u32 %s246_s27, 4  ;;  %s247_s9 = smov [#allocation4]   ;;  %s22_s28 = int_to_ptr.vmem [resolvable:$true] %s21_s28 }
   0x4   :  { %24 = dma.hbm_to_vmem [thread:$0]  %s20_s26, 128, %s22_s28, [#allocation3]  }
   0x5   :  { %s32_s10 = sshll.u32 %s247_s9, 4  ;;  %s33_s10 = int_to_ptr.vmem [resolvable:$true] %s32_s10 }
   0x6   :  { %35 = dma.hbm_to_vmem [thread:$0]  %s31_s8, 128, %s33_s10, [#allocation5]  }
   0x7   :  { %242 = dma.done.wait [#allocation3], 128  }
   0x8   :  { %243 = vsyncadd [#allocation3], 4294967168 }
   0x9   :  { %244 = dma.done.wait [#allocation5], 128  }
   0xa   :  { %245 = vsyncadd [#allocation5], 4294967168  ;;  %vm64_vm0 = vcmask 1045504   ;;  %vm60_vm1 = vcmask 48128   ;;  %v55_v0 = vld [vmem:[#allocation4] sm:$0x3f] }
   0xb   :  { %v54_v1 = vld [vmem:[#allocation2] sm:$0xff]  ;;  %v96_v2 = vld [vmem:[%s360_s3 + $0x38] sm:$0xff]  ;;  %181 = vmatpush.msk.msra.mxu0 %vm64_vm0, %v55_v0  ;;  %v95_v3 = vld [vmem:[%s360_s3 + $0x30] sm:$0xff]  ;;  %vm101_vm2 = vcmask 523264   ;;  %vm161_vm3 = vcmask 31744  }
   0xc   :  { %113 = vmatpush.msra.mxu1 %v96_v2  ;;  %182 = vmatmul.msk.f32.vlgmr.msra.gmra.mxu0 %vm60_vm1, %v54_v1  ;;  %v94_v4 = vld [vmem:[%s360_s3 + $0x28] sm:$0xff]  ;;  %v93_v5 = vld [vmem:[%s360_s3 + $0x20] sm:$0xff]  ;;  %v92_v6 = vld [vmem:[%s360_s3 + $0x18] sm:$0xff] }
   0xd   :  { %v91_v7 = vld [vmem:[%s360_s3 + $0x10] sm:$0xff]  ;;  %v90_v8 = vld [vmem:[%s360_s3 + $0x8] sm:$0xff]  ;;  %v89_v9 = vld [vmem:[%s360_s3] sm:$0xff] }
   0xe   :  { %114 = vmatpush.msra.mxu1 %v95_v3  ;;  %v133_v10 = vld [vmem:[%s362_s5 + $0x38] sm:$0xff]  ;;  %v132_v11 = vld [vmem:[%s362_s5 + $0x30] sm:$0xff]  ;;  %v131_v12 = vld [vmem:[%s362_s5 + $0x28] sm:$0xff] }
   0xf   :  { %149 = vmatpush.msra.mxu2 %v133_v10  ;;  %v130_v13 = vld [vmem:[%s362_s5 + $0x20] sm:$0xff]  ;;  %v129_v14 = vld [vmem:[%s362_s5 + $0x18] sm:$0xff]  ;;  %v128_v19 = vld [vmem:[%s362_s5 + $0x10] sm:$0xff] }
  0x10   :  { %115 = vmatpush.msra.mxu1 %v94_v4  ;;  %v187_v15 = vld [vmem:[%s359_s2] ss:$0 sm:$0xff]  ;;  %v127_v20 = vld [vmem:[%s362_s5 + $0x8] sm:$0xff] }
  0x11   :  { %150 = vmatpush.msra.mxu2 %v132_v11  ;;  %v126_v21 = vld [vmem:[%s362_s5] sm:$0xff] }
  0x12   :  { %116 = vmatpush.msra.mxu1 %v93_v5  ;;  %v188_v22 = vld [vmem:[%s361_s4] ss:$0 sm:$0xff] }
  0x13   :  { %151 = vmatpush.msra.mxu2 %v131_v12  ;;  %v189_v26 = vld [vmem:[%s363_s6] ss:$0 sm:$0xff] }
  0x14   :  { %117 = vmatpush.msra.mxu1 %v92_v6 }
  0x15   :  { %152 = vmatpush.msra.mxu2 %v130_v13 }
  0x16   :  { %118 = vmatpush.msra.mxu1 %v91_v7 }
  0x17   :  { %153 = vmatpush.msra.mxu2 %v129_v14 }
  0x18   :  { %119 = vmatpush.msra.mxu1 %v90_v8 }
  0x19   :  { %154 = vmatpush.msra.mxu2 %v128_v19 }
  0x1a   :  { %120 = vmatpush.msra.mxu1 %v89_v9 }
  0x1b   :  { %155 = vmatpush.msra.mxu2 %v127_v20 }
  0x1d   :  { %156 = vmatpush.msra.mxu2 %v126_v21 }
  0x89   :  { %v85_v16 = vpop.f32.mrf.mxu0 }
  0x8a   :  { %v86_v17 = vadd.f32 %v187_v15, %v85_v16 }
  0x8c   :  { %v88_v18 = vmax.f32 %v86_v17, 0.0 }
  0x8e   :  { %183 = vmatmul.msk.f32.vlgmr.msra.gmra.mxu1 %vm101_vm2, %v88_v18 }
 0x10b   :  { %v122_v23 = vpop.f32.mrf.mxu1 }
 0x10c   :  { %v123_v24 = vadd.f32 %v188_v22, %v122_v23 }
 0x10e   :  { %v125_v25 = vmax.f32 %v123_v24, 0.0 }
 0x110   :  { %184 = vmatmul.msk.f32.vlgmr.msra.gmra.mxu2 %vm101_vm2, %v125_v25 }
 0x193   :  { %v158_v27 = vpop.f32.mrf.mxu2 }
 0x194   :  { %v159_v28 = vadd.f32 %v189_v26, %v158_v27 }
 0x196   :  { %v162_v29 = vsel %vm161_vm3, %v159_v28, -inf }
 0x197   :  { %163 = vmax.xlane.f32.xlu0 %v162_v29 }
 0x20a   :  { %v164_v30 = vpop.xlane.xlu0 %163 }
 0x20b   :  { %v165_v31 = vsub.f32 %v159_v28, %v164_v30 }
 0x20d   :  { %v166_v32 = vmul.f32 1.442695, %v165_v31 }
 0x20f   :  { %190 = vpow2.f32 %v166_v32 }
 0x215   :  { %v191_v33 = vpop.eup %190 }
 0x216   :  { %v168_v34 = vsel %vm161_vm3, %v191_v33, 0.0 }
 0x217   :  { %169 = vadd.xlane.f32.xlu0 %v168_v34 }
 0x28a   :  { %v170_v35 = vpop.xlane.xlu0 %169 }
 0x28b   :  { %192 = vlog2.f32 %v170_v35 }
 0x291   :  { %v193_v36 = vpop.eup %192 }
 0x292   :  { %v172_v37 = vmul.f32 0.6931472, %v193_v36 }
 0x294   :  { %v173_v38 = vsub.f32 %v165_v31, %v172_v37 }
 0x296   :  { %174 = vst.msk [vmem:[%s364_s7] sm:$0xff] %vm161_vm3, %v173_v38 }
 0x297   :  { %179 = vsyncpa [#allocation3], 1 }
 0x298   :  { %180 = vsyncpa [#allocation5], 1 }

</bundles_post_ra>
